<compile_context>
chip_gen: v7x
topology: tpu7x:2x2x1
jax: 0.10.0
libtpu: 0.0.40
codegen_flags: <defaults>
</compile_context>

<pallas_src>
import functools

import jax
import jax.numpy as jnp
from jax.experimental import pallas as pl
from jax.experimental.pallas import tpu as pltpu

X_SIZE = 16
HIDDEN_DIMS = (512, 128, 32, 8)
OUT_DIM = 1
LANES = 128          # padded lane width for layers 3/4, tail matrix, output
MAX_TB = 512         # batch-tile cap (sweepable {512,1024}; fits VMEM everywhere)


def _round_up(n, m):
    return ((n + m - 1) // m) * m


def _select_dtypes():
    """Return (activation dtype, merged-output dtype) per TPU generation."""
    try:
        kind = jax.devices()[0].device_kind.lower()
    except Exception:
        kind = ""
    if "v7" in kind:
        # bf16 VALU available; 3.2 TB/s HBM -> keep lane-dense f32 output.
        return jnp.bfloat16, jnp.float32
    if "v6" in kind:
        # bf16 VALU available; writeback-heavy -> bf16 merged output.
        return jnp.bfloat16, jnp.bfloat16
    # v5e / v4 / unknown: no bf16 VALU -> f32 activation math, bf16 writeback.
    return jnp.float32, jnp.bfloat16


# --------------------------------------------------------------------------
# Pallas kernel: full MLP forward for one batch tile of TB rows.
#   inputs : x (TB,16) f32, w1 (16,512) bf16, w2 (512,128) bf16,
#            w34 (128,256) bf16 (w3 | w4, zero-padded),
#            tail (128,128) bf16 (I8 on lanes 0..7, w5 in column 8),
#            bias_pack (8,512) f32 (rows: b1,b2,b3,b4, one-hot b5)
#   output : merged (TB,128)  -- lanes 0..7 = hidden_output, lane 8 = logit
# --------------------------------------------------------------------------
def _disc_kernel(x_ref, w1_ref, w2_ref, w34_ref, tail_ref, bp_ref, out_ref,
                 *, act_dtype):
    def lrelu(h):
        # max-form LeakyReLU(0.2): identical to where(h>0,h,0.2h), 1 fewer VALU op
        return jnp.maximum(h, h * 0.2)

    # unpack the fused bias block (rows: b1, b2, b3, b4, one-hot b5)
    b1 = bp_ref[0:1, :].astype(act_dtype)            # (1, 512)
    b2 = bp_ref[1:2, :LANES].astype(act_dtype)       # (1, 128)
    b3 = bp_ref[2:3, :LANES].astype(act_dtype)       # (1, 128)  lanes 32+ are 0
    b4 = bp_ref[3:4, :LANES].astype(act_dtype)       # (1, 128)  lanes  8+ are 0
    b5row = bp_ref[4:5, :LANES]                      # (1, 128)  f32, lane 8 = b5

    x = x_ref[...].astype(jnp.bfloat16)                                  # (TB, 16)

    h = jnp.dot(x, w1_ref[...], preferred_element_type=jnp.float32)
    h = lrelu(h.astype(act_dtype) + b1)                                  # (TB, 512)

    h = jnp.dot(h.astype(jnp.bfloat16), w2_ref[...],
                preferred_element_type=jnp.float32)
    h = lrelu(h.astype(act_dtype) + b2)                                  # (TB, 128)

    h = jnp.dot(h.astype(jnp.bfloat16), w34_ref[:, 0:LANES],
                preferred_element_type=jnp.float32)
    h = lrelu(h.astype(act_dtype) + b3)                                  # lanes 32+ == 0

    h = jnp.dot(h.astype(jnp.bfloat16), w34_ref[:, LANES:2 * LANES],
                preferred_element_type=jnp.float32)
    h = lrelu(h.astype(act_dtype) + b4)                                  # lanes 8+ == 0

    # tail matmul: passes hidden through lanes 0..7, puts the logit in lane 8
    merged = jnp.dot(h.astype(jnp.bfloat16), tail_ref[...],
                     preferred_element_type=jnp.float32) + b5row
    out_ref[...] = merged.astype(out_ref.dtype)


# --------------------------------------------------------------------------
# JAX wrapper: batch tiling, lane-dense merged output, slicing.
# --------------------------------------------------------------------------
def discriminator_forward(x, kernel_params):
    """x: [B, X_SIZE] float32.  Returns (hidden [B,8] f32, output [B,1] f32)."""
    w1, w2, w34, tail, bias_pack = kernel_params
    B = x.shape[0]
    act_dtype, out_dtype = _select_dtypes()

    # batch tile: multiple of 8, capped at MAX_TB; if the whole batch would fit
    # in one step, split into two so both v7x TensorCores get work.
    TB = min(MAX_TB, _round_up(max(B, 1), 8))
    if pl.cdiv(B, TB) == 1 and B >= 16:
        TB = _round_up(pl.cdiv(B, 2), 8)
    n_steps = pl.cdiv(B, TB)
    Bp = n_steps * TB
    if Bp != B:  # pad only the ragged tail tile
        x = jnp.pad(x, ((0, Bp - B), (0, 0)))

    flops_per_row = 2 * (X_SIZE * 512 + 512 * 128 + 3 * 128 * 128)
    cost = pl.CostEstimate(
        flops=int(Bp) * flops_per_row,
        transcendentals=0,
        bytes_accessed=int(Bp * X_SIZE * 4
                           + Bp * LANES * jnp.dtype(out_dtype).itemsize
                           + sum(int(a.nbytes) for a in
                                 (w1, w2, w34, tail, bias_pack))))

    merged = pl.pallas_call(
        functools.partial(_disc_kernel, act_dtype=act_dtype),
        out_shape=jax.ShapeDtypeStruct((Bp, LANES), out_dtype),
        grid=(n_steps,),
        in_specs=[
            pl.BlockSpec((TB, X_SIZE), lambda i: (i, 0)),       # x tile
            pl.BlockSpec(w1.shape, lambda i: (0, 0)),           # weights stay
            pl.BlockSpec(w2.shape, lambda i: (0, 0)),           # VMEM-resident
            pl.BlockSpec(w34.shape, lambda i: (0, 0)),
            pl.BlockSpec(tail.shape, lambda i: (0, 0)),
            pl.BlockSpec(bias_pack.shape, lambda i: (0, 0)),    # fused biases
        ],
        out_specs=pl.BlockSpec((TB, LANES), lambda i: (i, 0)),  # lane-dense
        compiler_params=pltpu.CompilerParams(
            dimension_semantics=("parallel",)),                 # 2 TCs on v7x
        cost_estimate=cost,
    )(x, w1, w2, w34, tail, bias_pack)

    # TODO(synk): these slices materialize copies; return `merged` directly if
    #             the caller can consume the packed layout.
    hidden = merged[:B, :HIDDEN_DIMS[-1]].astype(jnp.float32)
    output = merged[:B, HIDDEN_DIMS[-1]:HIDDEN_DIMS[-1] + OUT_DIM].astype(jnp.float32)
    return hidden, output


# --------------------------------------------------------------------------
# Parameter setup (plain JAX glue): deterministic init + spectral norm,
# then packing into the kernel layout.
# --------------------------------------------------------------------------
def _spectral_normalize(w_out_in, key, n_iter=1, eps=1e-12):
    """PyTorch-style spectral norm: W / sigma(W), power iteration on random u."""
    out_f, _ = w_out_in.shape
    u = jax.random.normal(key, (out_f,), dtype=jnp.float32)
    u = u / (jnp.linalg.norm(u) + eps)
    for _ in range(n_iter):
        v = w_out_in.T @ u
        v = v / (jnp.linalg.norm(v) + eps)
        u = w_out_in @ v
        u = u / (jnp.linalg.norm(u) + eps)
    sigma = u @ (w_out_in @ v)
    return w_out_in / sigma


def make_params(key):
    """Returns PyTorch-style [(W[out,in], b[out])] after spectral norm, f32."""
    dims = (X_SIZE,) + HIDDEN_DIMS + (OUT_DIM,)
    params = []
    for i in range(len(dims) - 1):
        in_f, out_f = dims[i], dims[i + 1]
        key, kw, kb, ku = jax.random.split(key, 4)
        w = 0.02 * jax.random.normal(kw, (out_f, in_f), dtype=jnp.float32)
        w = _spectral_normalize(w, ku)
        b = 0.05 * jax.random.normal(kb, (out_f,), dtype=jnp.float32)
        params.append((w, b))
    return params


def pack_kernel_params(params):
    """Torch-style params -> (w1, w2, w34, tail, bias_pack) in kernel layout."""
    (W1, b1), (W2, b2), (W3, b3), (W4, b4), (W5, b5) = params
    w1 = W1.T.astype(jnp.bfloat16)                                   # (16, 512)
    w2 = W2.T.astype(jnp.bfloat16)                                   # (512, 128)

    # fused, zero-padded layer-3 | layer-4 weights: (128, 256)
    w34 = jnp.zeros((HIDDEN_DIMS[1], 2 * LANES), jnp.float32)
    w34 = w34.at[:, :HIDDEN_DIMS[2]].set(W3.T)                       # cols 0..31
    w34 = w34.at[:HIDDEN_DIMS[2], LANES:LANES + HIDDEN_DIMS[3]].set(W4.T)
    w34 = w34.astype(jnp.bfloat16)

    # tail matrix: identity on lanes 0..7 (hidden passthrough), w5 in column 8
    nh = HIDDEN_DIMS[3]
    tail = jnp.zeros((LANES, LANES), jnp.float32)
    tail = tail.at[jnp.arange(nh), jnp.arange(nh)].set(1.0)
    tail = tail.at[:nh, nh].set(W5[0, :])
    tail = tail.astype(jnp.bfloat16)

    bp = jnp.zeros((8, HIDDEN_DIMS[0]), jnp.float32)                 # (8, 512)
    bp = bp.at[0, :HIDDEN_DIMS[0]].set(b1)
    bp = bp.at[1, :HIDDEN_DIMS[1]].set(b2)
    bp = bp.at[2, :HIDDEN_DIMS[2]].set(b3)
    bp = bp.at[3, :HIDDEN_DIMS[3]].set(b4)
    bp = bp.at[4, HIDDEN_DIMS[3]].set(b5[0])                         # one-hot b5 (lane 8)
    return w1, w2, w34, tail, bp


def reference_forward(x, params):
    """Pure-JAX f32 reference of the PyTorch forward."""
    h = x
    for (w, b) in params[:-1]:
        h = h @ w.T + b
        h = jnp.where(h > 0, h, 0.2 * h)
    w5, b5 = params[-1]
    return h, h @ w5.T + b5


if __name__ == "__main__":
    key = jax.random.PRNGKey(0)
    kx, kp = jax.random.split(key)

    B = 8
    x = jax.random.normal(kx, (B, X_SIZE), dtype=jnp.float32)
    params = make_params(kp)
    kernel_params = pack_kernel_params(params)

    hidden, output = discriminator_forward(x, kernel_params)
    jax.block_until_ready(output)
    jax.block_until_ready(hidden)

    assert hidden.shape == (B, HIDDEN_DIMS[-1])
    assert output.shape == (B, OUT_DIM)

    ref_hidden, ref_output = reference_forward(x, params)
    assert bool(jnp.allclose(hidden, ref_hidden, rtol=5e-2, atol=1e-2)), \
        "hidden mismatch vs reference"
    assert bool(jnp.allclose(output, ref_output, rtol=5e-2, atol=1e-2)), \
        "output mismatch vs reference"

    print("KERNEL_OK")
</pallas_src>

<mosaic_0001>
module attributes {stable_mosaic.version = 11 : i64} {
  func.func @_disc_kernel(%arg0: i32, %arg1: memref<8x16xf32, #tpu.memory_space<vmem>>, %arg2: memref<16x512xbf16, #tpu.memory_space<vmem>>, %arg3: memref<512x128xbf16, #tpu.memory_space<vmem>>, %arg4: memref<128x256xbf16, #tpu.memory_space<vmem>>, %arg5: memref<128x128xbf16, #tpu.memory_space<vmem>>, %arg6: memref<8x512xf32, #tpu.memory_space<vmem>>, %arg7: memref<8x128xbf16, #tpu.memory_space<vmem>>) attributes {dimension_semantics = [#tpu.dimension_semantics<parallel>], iteration_bounds = array<i64: 1>, scalar_prefetch = 0 : i64, scratch_operands = 0 : i64, tpu.core_type = #tpu.core_type<tc>, window_params = [{transform_indices = @transform_0, window_bounds = array<i64: 8, 16>}, {pipeline_mode = #tpu.pipeline_mode<synchronous>, transform_indices = @transform_1, window_bounds = array<i64: 16, 512>}, {pipeline_mode = #tpu.pipeline_mode<synchronous>, transform_indices = @transform_2, window_bounds = array<i64: 512, 128>}, {pipeline_mode = #tpu.pipeline_mode<synchronous>, transform_indices = @transform_3, window_bounds = array<i64: 128, 256>}, {pipeline_mode = #tpu.pipeline_mode<synchronous>, transform_indices = @transform_4, window_bounds = array<i64: 128, 128>}, {pipeline_mode = #tpu.pipeline_mode<synchronous>, transform_indices = @transform_5, window_bounds = array<i64: 8, 512>}, {transform_indices = @transform_6, window_bounds = array<i64: 8, 128>}]} {
    %c0 = arith.constant 0 : index
    %c0_0 = arith.constant 0 : index
    %0 = vector.load %arg6[%c0, %c0_0] : memref<8x512xf32, #tpu.memory_space<vmem>>, vector<1x512xf32>
    %c1 = arith.constant 1 : index
    %c0_1 = arith.constant 0 : index
    %1 = vector.load %arg6[%c1, %c0_1] : memref<8x512xf32, #tpu.memory_space<vmem>>, vector<1x128xf32>
    %c2 = arith.constant 2 : index
    %c0_2 = arith.constant 0 : index
    %2 = vector.load %arg6[%c2, %c0_2] : memref<8x512xf32, #tpu.memory_space<vmem>>, vector<1x128xf32>
    %c3 = arith.constant 3 : index
    %c0_3 = arith.constant 0 : index
    %3 = vector.load %arg6[%c3, %c0_3] : memref<8x512xf32, #tpu.memory_space<vmem>>, vector<1x128xf32>
    %c4 = arith.constant 4 : index
    %c0_4 = arith.constant 0 : index
    %4 = vector.load %arg6[%c4, %c0_4] : memref<8x512xf32, #tpu.memory_space<vmem>>, vector<1x128xf32>
    %c0_5 = arith.constant 0 : index
    %c0_6 = arith.constant 0 : index
    %5 = vector.load %arg1[%c0_5, %c0_6] : memref<8x16xf32, #tpu.memory_space<vmem>>, vector<8x16xf32>
    %6 = arith.truncf %5 : vector<8x16xf32> to vector<8x16xbf16>
    %c0_7 = arith.constant 0 : index
    %c0_8 = arith.constant 0 : index
    %7 = vector.load %arg2[%c0_7, %c0_8] : memref<16x512xbf16, #tpu.memory_space<vmem>>, vector<16x512xbf16>
    %cst = arith.constant dense<0.000000e+00> : vector<8x512xf32>
    %8 = tpu.matmul %6, %7, %cst {dimension_numbers = #tpu.dot_dimension_numbers<[1], [0], [0], [1], [0, 0, 1, 1], [], []>} : vector<8x16xbf16>, vector<16x512xbf16>, vector<8x512xf32> -> vector<8x512xf32>
    %9 = vector.broadcast %0 : vector<1x512xf32> to vector<8x512xf32>
    %10 = arith.addf %8, %9 : vector<8x512xf32>
    %cst_9 = arith.constant 2.000000e-01 : f32
    %11 = vector.broadcast %cst_9 : f32 to vector<8x512xf32>
    %12 = arith.mulf %10, %11 : vector<8x512xf32>
    %13 = arith.maximumf %10, %12 : vector<8x512xf32>
    %14 = arith.truncf %13 : vector<8x512xf32> to vector<8x512xbf16>
    %c0_10 = arith.constant 0 : index
    %c0_11 = arith.constant 0 : index
    %15 = vector.load %arg3[%c0_10, %c0_11] : memref<512x128xbf16, #tpu.memory_space<vmem>>, vector<512x128xbf16>
    %cst_12 = arith.constant dense<0.000000e+00> : vector<8x128xf32>
    %16 = tpu.matmul %14, %15, %cst_12 {dimension_numbers = #tpu.dot_dimension_numbers<[1], [0], [0], [1], [0, 0, 1, 1], [], []>} : vector<8x512xbf16>, vector<512x128xbf16>, vector<8x128xf32> -> vector<8x128xf32>
    %17 = vector.broadcast %1 : vector<1x128xf32> to vector<8x128xf32>
    %18 = arith.addf %16, %17 : vector<8x128xf32>
    %cst_13 = arith.constant 2.000000e-01 : f32
    %19 = vector.broadcast %cst_13 : f32 to vector<8x128xf32>
    %20 = arith.mulf %18, %19 : vector<8x128xf32>
    %21 = arith.maximumf %18, %20 : vector<8x128xf32>
    %22 = arith.truncf %21 : vector<8x128xf32> to vector<8x128xbf16>
    %c0_14 = arith.constant 0 : index
    %c0_15 = arith.constant 0 : index
    %23 = vector.load %arg4[%c0_14, %c0_15] : memref<128x256xbf16, #tpu.memory_space<vmem>>, vector<128x128xbf16>
    %cst_16 = arith.constant dense<0.000000e+00> : vector<8x128xf32>
    %24 = tpu.matmul %22, %23, %cst_16 {dimension_numbers = #tpu.dot_dimension_numbers<[1], [0], [0], [1], [0, 0, 1, 1], [], []>} : vector<8x128xbf16>, vector<128x128xbf16>, vector<8x128xf32> -> vector<8x128xf32>
    %25 = vector.broadcast %2 : vector<1x128xf32> to vector<8x128xf32>
    %26 = arith.addf %24, %25 : vector<8x128xf32>
    %cst_17 = arith.constant 2.000000e-01 : f32
    %27 = vector.broadcast %cst_17 : f32 to vector<8x128xf32>
    %28 = arith.mulf %26, %27 : vector<8x128xf32>
    %29 = arith.maximumf %26, %28 : vector<8x128xf32>
    %30 = arith.truncf %29 : vector<8x128xf32> to vector<8x128xbf16>
    %c0_18 = arith.constant 0 : index
    %c128 = arith.constant 128 : index
    %31 = vector.load %arg4[%c0_18, %c128] : memref<128x256xbf16, #tpu.memory_space<vmem>>, vector<128x128xbf16>
    %cst_19 = arith.constant dense<0.000000e+00> : vector<8x128xf32>
    %32 = tpu.matmul %30, %31, %cst_19 {dimension_numbers = #tpu.dot_dimension_numbers<[1], [0], [0], [1], [0, 0, 1, 1], [], []>} : vector<8x128xbf16>, vector<128x128xbf16>, vector<8x128xf32> -> vector<8x128xf32>
    %33 = vector.broadcast %3 : vector<1x128xf32> to vector<8x128xf32>
    %34 = arith.addf %32, %33 : vector<8x128xf32>
    %cst_20 = arith.constant 2.000000e-01 : f32
    %35 = vector.broadcast %cst_20 : f32 to vector<8x128xf32>
    %36 = arith.mulf %34, %35 : vector<8x128xf32>
    %37 = arith.maximumf %34, %36 : vector<8x128xf32>
    %38 = arith.truncf %37 : vector<8x128xf32> to vector<8x128xbf16>
    %c0_21 = arith.constant 0 : index
    %c0_22 = arith.constant 0 : index
    %39 = vector.load %arg5[%c0_21, %c0_22] : memref<128x128xbf16, #tpu.memory_space<vmem>>, vector<128x128xbf16>
    %cst_23 = arith.constant dense<0.000000e+00> : vector<8x128xf32>
    %40 = tpu.matmul %38, %39, %cst_23 {dimension_numbers = #tpu.dot_dimension_numbers<[1], [0], [0], [1], [0, 0, 1, 1], [], []>} : vector<8x128xbf16>, vector<128x128xbf16>, vector<8x128xf32> -> vector<8x128xf32>
    %41 = vector.broadcast %4 : vector<1x128xf32> to vector<8x128xf32>
    %42 = arith.addf %40, %41 : vector<8x128xf32>
    %43 = arith.truncf %42 : vector<8x128xf32> to vector<8x128xbf16>
    %c0_24 = arith.constant 0 : index
    %c0_25 = arith.constant 0 : index
    %44 = vector.load %arg7[%c0_24, %c0_25] : memref<8x128xbf16, #tpu.memory_space<vmem>>, vector<8x128xbf16>
    tpu.vector_store %arg7[%c0_24, %c0_25], %43 {strides = array<i32>} : memref<8x128xbf16, #tpu.memory_space<vmem>>, vector<8x128xbf16>,
    return
  }
  func.func @transform_0(%arg0: i32) -> (i32, i32) {
    %c0_i32 = arith.constant 0 : i32
    %c0_i32_0 = arith.constant 0 : i32
    return %arg0, %c0_i32 : i32, i32
  }
  func.func @transform_1(%arg0: i32) -> (i32, i32) {
    %c0_i32 = arith.constant 0 : i32
    %c0_i32_0 = arith.constant 0 : i32
    %c0_i32_1 = arith.constant 0 : i32
    return %c0_i32, %c0_i32_0 : i32, i32
  }
  func.func @transform_2(%arg0: i32) -> (i32, i32) {
    %c0_i32 = arith.constant 0 : i32
    %c0_i32_0 = arith.constant 0 : i32
    %c0_i32_1 = arith.constant 0 : i32
    return %c0_i32, %c0_i32_0 : i32, i32
  }
  func.func @transform_3(%arg0: i32) -> (i32, i32) {
    %c0_i32 = arith.constant 0 : i32
    %c0_i32_0 = arith.constant 0 : i32
    %c0_i32_1 = arith.constant 0 : i32
    return %c0_i32, %c0_i32_0 : i32, i32
  }
  func.func @transform_4(%arg0: i32) -> (i32, i32) {
    %c0_i32 = arith.constant 0 : i32
    %c0_i32_0 = arith.constant 0 : i32
    %c0_i32_1 = arith.constant 0 : i32
    return %c0_i32, %c0_i32_0 : i32, i32
  }
  func.func @transform_5(%arg0: i32) -> (i32, i32) {
    %c0_i32 = arith.constant 0 : i32
    %c0_i32_0 = arith.constant 0 : i32
    %c0_i32_1 = arith.constant 0 : i32
    return %c0_i32, %c0_i32_0 : i32, i32
  }
  func.func @transform_6(%arg0: i32) -> (i32, i32) {
    %c0_i32 = arith.constant 0 : i32
    %c0_i32_0 = arith.constant 0 : i32
    return %arg0, %c0_i32 : i32, i32
  }
}

</mosaic_0001>

<bundles_post_ra>
// kernel: tpu_custom_call.1
= control target key start
LH: loop header
LB: loop body
LE: loop exit
PB: predicated region body
PF: predicated region fallthrough
CT: control target
= control target key end

     0   :  { %11 = vsyncpa [#allocation3], 0  ;;  %s1539_s0 = inlined_call_operand.hbm [shape: f32[8,16], index: 0, kind: input, shape index: {}]   ;;  %s1540_s1 = inlined_call_operand.hbm [shape: bf16[16,512], index: 1, kind: input, shape index: {}]   ;;  %s1541_s2 = inlined_call_operand.hbm [shape: bf16[512,128], index: 2, kind: input, shape index: {}]   ;;  %s1542_s3 = inlined_call_operand.hbm [shape: bf16[128,256], index: 3, kind: input, shape index: {}]   ;;  %s1543_s4 = inlined_call_operand.hbm [shape: bf16[128,128], index: 4, kind: input, shape index: {}]   ;;  %s1544_s5 = inlined_call_operand.hbm [shape: f32[8,512], index: 5, kind: input, shape index: {}]   ;;  %s1545_s6 = inlined_call_operand.hbm [shape: bf16[8,128], index: 6, kind: output, shape index: {}]  }
   0x1   :  { %12 = vsyncpa [#allocation6], 0 }
   0x2   :  { %13 = vsyncpa [#allocation9], 0 }
   0x3   :  { %14 = vsyncpa [#allocation12], 0 }
   0x4   :  { %15 = vsyncpa [#allocation4], 0  ;;  %s1365_s21 = smov [#allocation5]   ;;  %s1201_s25 = scalar_lea.hbm %s1540_s1, 512 }
   0x5   :  { %s31_s22 = sshll.u32 %s1365_s21, 4  ;;  %p1202_p0 = scmp.ne.s32.totalorder %s1540_s1, %s1201_s25  ;;  %s32_s22 = int_to_ptr.vmem [resolvable:$true] %s31_s22 }
   0x6   :  { %p1205_p1 = scmp.lt.u32.totalorder %s1201_s25, %s1540_s1 }
   0x8   :  { %p1207_p2 = pnand %p1205_p1, %p1202_p0 }
   0xa   :  { %1210 = shalt.err (!%p1207_p2)
}
   0xb   :  { %s1211_s30 = scalar_lea.vmem %s32_s22, 512  ;;  %p1216_p4 = scmp.lt.s32.totalorder %s32_s22, %s32_s22 }
   0xc   :  { %p1212_p3 = scmp.ne.s32.totalorder %s32_s22, %s1211_s30  ;;  %p1217_p5 = scmp.lt.s32.totalorder %s1211_s30, %s1211_s30 }
   0xe   :  { %p1218_p6 = por %p1217_p5, %p1216_p4 }
  0x10   :  { %p1219_p7 = pnand %p1218_p6, %p1212_p3 }
  0x12   :  { %1222 = shalt.err (!%p1219_p7)
}
  0x13   :  { %s1366_s7 = smov 256   ;;  %s1367_s8 = smov 16  }
  0x14   :  { %37 = dma.hbm_to_vmem [thread:$0]  %s1540_s1, 512, %s32_s22, [#allocation6], %s1366_s7, %s1366_s7, %s1367_s8  }
  0x15   :  { %s1368_s11 = smov [#allocation8]   ;;  %s1223_s15 = scalar_lea.hbm %s1542_s3, 2048 }
  0x16   :  { %s55_s12 = sshll.u32 %s1368_s11, 4  ;;  %p1224_p8 = scmp.ne.s32.totalorder %s1542_s3, %s1223_s15  ;;  %s56_s12 = int_to_ptr.vmem [resolvable:$true] %s55_s12 }
  0x17   :  { %p1227_p9 = scmp.lt.u32.totalorder %s1223_s15, %s1542_s3 }
  0x19   :  { %p1229_p10 = pnand %p1227_p9, %p1224_p8 }
  0x1b   :  { %1232 = shalt.err (!%p1229_p10)
}
  0x1c   :  { %s1233_s20 = scalar_lea.vmem %s56_s12, 2048  ;;  %p1238_p12 = scmp.lt.s32.totalorder %s56_s12, %s56_s12 }
  0x1d   :  { %p1234_p11 = scmp.ne.s32.totalorder %s56_s12, %s1233_s20  ;;  %p1239_p13 = scmp.lt.s32.totalorder %s1233_s20, %s1233_s20 }
  0x1f   :  { %p1240_p0 = por %p1239_p13, %p1238_p12 }
  0x21   :  { %p1241_p1 = pnand %p1240_p0, %p1234_p11 }
  0x23   :  { %1244 = shalt.err (!%p1241_p1)
}
  0x24   :  { %s1369_s1 = smov 128   ;;  %s1370_s21 = smov 8  }
  0x25   :  { %61 = dma.hbm_to_vmem [thread:$0]  %s1542_s3, 2048, %s56_s12, [#allocation9], %s1369_s1, %s1369_s1, %s1370_s21  }
  0x26   :  { %s1371_s24 = smov [#allocation2]   ;;  %s1372_s26 = smov [#allocation7]  }
  0x27   :  { %s22_s25 = sshll.u32 %s1371_s24, 4  ;;  %s43_s27 = sshll.u32 %s1372_s26, 4  ;;  %s23_s25 = int_to_ptr.vmem [resolvable:$true] %s22_s25  ;;  %s1440_s27 = int_to_ptr.vmem [resolvable:$true] %s43_s27 }
  0x28   :  { %s1245_s30 = scalar_lea.hbm %s1539_s0, 128 }
  0x29   :  { %p1246_p2 = scmp.ne.s32.totalorder %s1539_s0, %s1245_s30  ;;  %p1249_p3 = scmp.lt.u32.totalorder %s1245_s30, %s1539_s0 }
  0x2b   :  { %p1251_p4 = pnand %p1249_p3, %p1246_p2 }
  0x2d   :  { %1254 = shalt.err (!%p1251_p4)
}
  0x2e   :  { %s1255_s3 = scalar_lea.vmem %s23_s25, 128  ;;  %p1260_p6 = scmp.lt.s32.totalorder %s23_s25, %s23_s25 }
  0x2f   :  { %p1256_p5 = scmp.ne.s32.totalorder %s23_s25, %s1255_s3  ;;  %p1261_p7 = scmp.lt.s32.totalorder %s1255_s3, %s1255_s3 }
  0x31   :  { %p1262_p8 = por %p1261_p7, %p1260_p6 }
  0x33   :  { %p1263_p9 = pnand %p1262_p8, %p1256_p5 }
  0x35   :  { %1266 = shalt.err (!%p1263_p9)
}
  0x36   :  { %25 = dma.hbm_to_vmem [thread:$0]  %s1539_s0, 128, %s23_s25, [#allocation3]  }
  0x37   :  { %s1267_s15 = scalar_lea.hbm %s1541_s2, 4096 }
  0x38   :  { %p1268_p10 = scmp.ne.s32.totalorder %s1541_s2, %s1267_s15  ;;  %p1271_p11 = scmp.lt.u32.totalorder %s1267_s15, %s1541_s2 }
  0x3a   :  { %p1273_p12 = pnand %p1271_p11, %p1268_p10 }
  0x3c   :  { %1276 = shalt.err (!%p1273_p12)
}
  0x3d   :  { %s1277_s20 = scalar_lea.vmem %s1440_s27, 4096  ;;  %p1282_p0 = scmp.lt.s32.totalorder %s1440_s27, %s1440_s27 }
  0x3e   :  { %p1278_p13 = scmp.ne.s32.totalorder %s1440_s27, %s1277_s20  ;;  %p1283_p1 = scmp.lt.s32.totalorder %s1277_s20, %s1277_s20 }
  0x40   :  { %p1284_p2 = por %p1283_p1, %p1282_p0 }
  0x42   :  { %p1285_p3 = pnand %p1284_p2, %p1278_p13 }
  0x44   :  { %1288 = shalt.err (!%p1285_p3)
}
  0x45   :  { %s1373_s0 = smov 64   ;;  %s1374_s1 = smov 4  }
  0x46   :  { %49 = dma.hbm_to_vmem [thread:$0]  %s1541_s2, 4096, %s1440_s27, [#allocation6], %s1373_s0, %s1373_s0, %s1374_s1  }
  0x47   :  { %s1375_s23 = smov [#allocation10]   ;;  %s1376_s25 = smov [#allocation11]  }
  0x48   :  { %s67_s24 = sshll.u32 %s1375_s23, 4  ;;  %s80_s26 = sshll.u32 %s1376_s25, 4  ;;  %s68_s24 = int_to_ptr.vmem [resolvable:$true] %s67_s24  ;;  %s81_s26 = int_to_ptr.vmem [resolvable:$true] %s80_s26 }
  0x49   :  { %s1289_s30 = scalar_lea.hbm %s1543_s4, 1024 }
  0x4a   :  { %p1290_p4 = scmp.ne.s32.totalorder %s1543_s4, %s1289_s30  ;;  %p1293_p5 = scmp.lt.u32.totalorder %s1289_s30, %s1543_s4 }
  0x4c   :  { %p1295_p6 = pnand %p1293_p5, %p1290_p4 }
  0x4e   :  { %1298 = shalt.err (!%p1295_p6)
}
  0x4f   :  { %s1299_s2 = scalar_lea.vmem %s68_s24, 1024  ;;  %p1304_p8 = scmp.lt.s32.totalorder %s68_s24, %s68_s24 }
  0x50   :  { %p1300_p7 = scmp.ne.s32.totalorder %s68_s24, %s1299_s2  ;;  %p1305_p9 = scmp.lt.s32.totalorder %s1299_s2, %s1299_s2 }
  0x52   :  { %p1306_p10 = por %p1305_p9, %p1304_p8 }
  0x54   :  { %p1307_p11 = pnand %p1306_p10, %p1300_p7 }
  0x56   :  { %1310 = shalt.err (!%p1307_p11)
}
  0x57   :  { %73 = dma.hbm_to_vmem [thread:$0]  %s1543_s4, 1024, %s68_s24, [#allocation9], %s1373_s0, %s1373_s0, %s1374_s1  }
  0x58   :  { %s1311_s13 = scalar_lea.hbm %s1544_s5, 512 }
  0x59   :  { %p1312_p12 = scmp.ne.s32.totalorder %s1544_s5, %s1311_s13  ;;  %p1315_p13 = scmp.lt.u32.totalorder %s1311_s13, %s1544_s5 }
  0x5b   :  { %p1317_p0 = pnand %p1315_p13, %p1312_p12 }
  0x5d   :  { %1320 = shalt.err (!%p1317_p0)
}
  0x5e   :  { %s1321_s18 = scalar_lea.vmem %s81_s26, 512  ;;  %p1326_p2 = scmp.lt.s32.totalorder %s81_s26, %s81_s26 }
  0x5f   :  { %p1322_p1 = scmp.ne.s32.totalorder %s81_s26, %s1321_s18  ;;  %p1327_p3 = scmp.lt.s32.totalorder %s1321_s18, %s1321_s18 }
  0x61   :  { %p1328_p4 = por %p1327_p3, %p1326_p2 }
  0x63   :  { %p1329_p5 = pnand %p1328_p4, %p1322_p1 }
  0x65   :  { %1332 = shalt.err (!%p1329_p5)
}
  0x66   :  { %83 = dma.hbm_to_vmem [thread:$0]  %s1544_s5, 512, %s81_s26, [#allocation12]  }
  0x67   :  { %1355 = dma.done.wait [#allocation3], 128  }
  0x68   :  { %1356 = vsyncadd [#allocation3], 4294967168 }
  0x69   :  { %1357 = dma.done.wait [#allocation6], 4608  }
  0x6a   :  { %1358 = vsyncadd [#allocation6], 4294962688 }
  0x6b   :  { %1359 = dma.done.wait [#allocation9], 3072  }
  0x6c   :  { %1360 = vsyncadd [#allocation9], 4294964224 }
  0x6d   :  { %1361 = dma.done.wait [#allocation12], 512  }
  0x6e   :  { %1362 = vsyncadd [#allocation12], 4294966784  ;;  %v1377_v0 = vmov 0   ;;  %v1139_v1 = vld [vmem:[#allocation5 + $0x4] ss:$16 sps:$4 sm:$0xff]   ;;  %v108_v3 = vld [vmem:[#allocation2] sm:$0xff]  ;;  %v115_v40 = vlaneseq }
  0x6f   :  { %191 = vmatprep.mubr.bf16.mxu1 %v1377_v0  ;;  %v1141_v2 = vld [vmem:[#allocation5] ss:$16 sps:$4 sm:$0xff]   ;;  %159 = vmatprep.subr.bf16.mxu1 %v1139_v1  ;;  %v109_v4 = vpack.c.bf16 %v108_v3, %v108_v3  ;;  %v1142_v5 = vld [vmem:[#allocation5 + $0x8] ss:$16 sps:$4 sm:$0xff]   ;;  %v1144_v6 = vld [vmem:[#allocation5 + $0xc] ss:$16 sps:$4 sm:$0xff]  }
  0x70   :  { %160 = vmatpush1.bf16.msra.mxu1 %v1141_v2  ;;  %vm155_vm0 = vcmask 130048   ;;  %v1145_v7 = vld [vmem:[#allocation7 + $0x40] sm:$0xff]   ;;  %v1147_v9 = vld [vmem:[#allocation7 + $0x48] sm:$0xff]   ;;  %v1149_v11 = vld [vmem:[#allocation7 + $0x50] sm:$0xff]   ;;  %v1378_v39 = vmov 0.0   ;;  %v116_v41 = vshrl.u32 %v115_v40, 7 }
  0x71   :  { %200 = vmatprep.subr.bf16.mxu1 %v1144_v6  ;;  %v1146_v8 = vld [vmem:[#allocation7] sm:$0xff]   ;;  %992 = vmatprep.subr.bf16.mxu0 %v1145_v7  ;;  %v1148_v10 = vld [vmem:[#allocation7 + $0x8] sm:$0xff]   ;;  %v1151_v13 = vld [vmem:[#allocation7 + $0x10] sm:$0xff]   ;;  %vm1379_vm1 = vmmov 0   ;;  %s1380_s5 = smov [#allocation13]  }
  0x72   :  { %993 = vmatpush3.bf16.msra.mxu0 %v1146_v8  ;;  %v1150_v12 = vld [vmem:[#allocation7 + $0xc0] sm:$0xff]   ;;  %v1153_v15 = vld [vmem:[#allocation7 + $0x58] sm:$0xff]   ;;  %v1154_v16 = vld [vmem:[#allocation7 + $0xc8] sm:$0xff]   ;;  %v117_v42 = vsub.s32 0, %v116_v41  ;;  %v121_v44 = vsub.s32 1, %v116_v41  ;;  %v125_v50 = vsub.s32 2, %v116_v41 }
  0x73   :  { %934 = vmatmul.mubr.msk.bf16.vlgmr.msra.gmra.mrb[0].mxu1 %vm155_vm0, %v109_v4  ;;  %994 = vmatprep.subr.bf16.mxu0 %v1147_v9  ;;  %v1152_v14 = vld [vmem:[#allocation7 + $0x80] sm:$0xff]   ;;  %v1155_v17 = vld [vmem:[#allocation7 + $0x18] sm:$0xff]   ;;  %v1156_v18 = vld [vmem:[#allocation7 + $0x88] sm:$0xff]   ;;  %v129_v53 = vsub.s32 3, %v116_v41  ;;  %s918_s20 = sshll.u32 %s1380_s5, 4  ;;  %s919_s20 = int_to_ptr.vmem [resolvable:$true] %s918_s20 }
  0x74   :  { %201 = vmatpush1.bf16.msra.mxu1 %v1142_v5  ;;  %232 = vmatprep.mubr.bf16.mxu1 %v1377_v0  ;;  %v1157_v19 = vld [vmem:[#allocation7 + $0x60] sm:$0xff]   ;;  %v1158_v20 = vld [vmem:[#allocation7 + $0xd0] sm:$0xff]   ;;  %v1161_v23 = vld [vmem:[#allocation7 + $0x68] sm:$0xff]   ;;  %s1333_s0 = scalar_lea.vmem %s919_s20, 64  ;;  %p1338_p7 = scmp.lt.s32.totalorder %s919_s20, %s919_s20 }
  0x75   :  { %1014 = vmatprep.subr.bf16.mxu1 %v1150_v12  ;;  %v1159_v21 = vld [vmem:[#allocation7 + $0x20] sm:$0xff]   ;;  %v1160_v22 = vld [vmem:[#allocation7 + $0x90] sm:$0xff]   ;;  %v1162_v24 = vld [vmem:[#allocation7 + $0xd8] sm:$0xff]   ;;  %p1334_p6 = scmp.ne.s32.totalorder %s919_s20, %s1333_s0  ;;  %p1339_p8 = scmp.lt.s32.totalorder %s1333_s0, %s1333_s0 }
  0x76   :  { %995 = vmatpush3.bf16.msra.mxu0 %v1148_v10  ;;  %v1163_v25 = vld [vmem:[#allocation7 + $0x28] sm:$0xff]   ;;  %v1164_v26 = vld [vmem:[#allocation7 + $0x98] sm:$0xff]   ;;  %v1165_v27 = vld [vmem:[#allocation7 + $0x70] sm:$0xff]  }
  0x77   :  { %996 = vmatprep.subr.bf16.mxu0 %v1149_v11  ;;  %v1166_v28 = vld [vmem:[#allocation7 + $0xe0] sm:$0xff]   ;;  %v1167_v29 = vld [vmem:[#allocation7 + $0x30] sm:$0xff]   ;;  %v1169_v31 = vld [vmem:[#allocation7 + $0x78] sm:$0xff]   ;;  %p1340_p9 = por %p1339_p8, %p1338_p7 }
  0x78   :  { %v1168_v30 = vld [vmem:[#allocation7 + $0xa0] sm:$0xff]   ;;  %v1170_v32 = vld [vmem:[#allocation7 + $0xe8] sm:$0xff]   ;;  %v1171_v33 = vld [vmem:[#allocation7 + $0x38] sm:$0xff]  }
  0x79   :  { %v1172_v34 = vld [vmem:[#allocation7 + $0xa8] sm:$0xff]   ;;  %v1173_v35 = vld [vmem:[#allocation7 + $0xf0] sm:$0xff]   ;;  %v1175_v37 = vld [vmem:[#allocation7 + $0xf8] sm:$0xff]   ;;  %p1341_p10 = pnand %p1340_p9, %p1334_p6 }
  0x7a   :  { %997 = vmatpush3.bf16.msra.mxu0 %v1151_v13  ;;  %v1174_v36 = vld [vmem:[#allocation7 + $0xb0] sm:$0xff]   ;;  %v1176_v38 = vld [vmem:[#allocation7 + $0xb8] sm:$0xff]   ;;  %v1177_v63 = vld [vmem:[#allocation8] ss:$8 sps:$4 sm:$0xff]  }
  0x7b   :  { %935 = vmatmul.mubr.msk.bf16.vlgmr.msra.gmra.mrb[4].mxu1 %vm155_vm0, %v109_v4  ;;  %998 = vmatprep.subr.bf16.mxu0 %v1153_v15  ;;  %v103_v43 = vld [vmem:[#allocation11] ss:$8 sm:$0xf] }
  0x7c   :  { %1015 = vmatpush3.bf16.msra.mxu1 %v1152_v14  ;;  %v118_v45 = vrot.slane %v103_v43, %v117_v42  ;;  %v122_v46 = vrot.slane %v103_v43, %v121_v44  ;;  %v126_v58 = vrot.slane %v103_v43, %v125_v50  ;;  %v130_v59 = vrot.slane %v103_v43, %v129_v53  ;;  %v1178_v8 = vld [vmem:[#allocation8 + $0x10] ss:$8 sps:$4 sm:$0xff]   ;;  %v1179_v12 = vld [vmem:[#allocation8 + $0x20] ss:$8 sps:$4 sm:$0xff]   ;;  %v1191_v42 = vld [vmem:[#allocation8 + $0x64] ss:$8 sps:$4 sm:$0xff]  }
  0x7d   :  { %1016 = vmatprep.subr.bf16.mxu1 %v1154_v16  ;;  %v1180_v14 = vld [vmem:[#allocation8 + $0x30] ss:$8 sps:$4 sm:$0xff]   ;;  %v1181_v15 = vld [vmem:[#allocation8 + $0x40] ss:$8 sps:$4 sm:$0xff]   ;;  %v1192_v43 = vld [vmem:[#allocation8 + $0x74] ss:$8 sps:$4 sm:$0xff]  }
  0x7e   :  { %999 = vmatpush3.bf16.msra.mxu0 %v1155_v17  ;;  %v1182_v16 = vld [vmem:[#allocation8 + $0x50] ss:$8 sps:$4 sm:$0xff]   ;;  %v1183_v17 = vld [vmem:[#allocation8 + $0x60] ss:$8 sps:$4 sm:$0xff]  }
  0x7f   :  { %1000 = vmatprep.subr.bf16.mxu0 %v1157_v19  ;;  %v1185_v19 = vld [vmem:[#allocation8 + $0x4] ss:$8 sps:$4 sm:$0xff]   ;;  %v105_v50 = vld [vmem:[#allocation11 + $0x2] ss:$0 sm:$0xff] }
  0x80   :  { %1017 = vmatpush3.bf16.msra.mxu1 %v1156_v18  ;;  %v1184_v18 = vld [vmem:[#allocation8 + $0x70] ss:$8 sps:$4 sm:$0xff]   ;;  %v1193_v44 = vld [vmem:[#allocation10] sm:$0xff]  }
  0x81   :  { %1018 = vmatprep.subr.bf16.mxu1 %v1158_v20  ;;  %v1186_v20 = vld [vmem:[#allocation8 + $0x14] ss:$8 sps:$4 sm:$0xff]  }
  0x82   :  { %1001 = vmatpush3.bf16.msra.mxu0 %v1159_v21  ;;  %v1187_v21 = vld [vmem:[#allocation8 + $0x24] ss:$8 sps:$4 sm:$0xff]  }
  0x83   :  { %1002 = vmatprep.subr.bf16.mxu0 %v1161_v23  ;;  %v1189_v23 = vld [vmem:[#allocation8 + $0x44] ss:$8 sps:$4 sm:$0xff]  }
  0x84   :  { %1019 = vmatpush3.bf16.msra.mxu1 %v1160_v22  ;;  %v1188_v22 = vld [vmem:[#allocation8 + $0x34] ss:$8 sps:$4 sm:$0xff]  }
  0x85   :  { %1020 = vmatprep.subr.bf16.mxu1 %v1162_v24  ;;  %v1190_v24 = vld [vmem:[#allocation8 + $0x54] ss:$8 sps:$4 sm:$0xff]  }
  0x86   :  { %1003 = vmatpush3.bf16.msra.mxu0 %v1163_v25 }
  0x87   :  { %1004 = vmatprep.subr.bf16.mxu0 %v1165_v27 }
  0x88   :  { %1021 = vmatpush3.bf16.msra.mxu1 %v1164_v26 }
  0x89   :  { %1022 = vmatprep.subr.bf16.mxu1 %v1166_v28 }
  0x8a   :  { %1005 = vmatpush3.bf16.msra.mxu0 %v1167_v29 }
  0x8b   :  { %1006 = vmatprep.subr.bf16.mxu0 %v1169_v31 }
  0x8c   :  { %1023 = vmatpush3.bf16.msra.mxu1 %v1168_v30  ;;  %v104_v30 = vld [vmem:[#allocation11 + $0x1] ss:$0 sm:$0xff] }
  0x8d   :  { %1024 = vmatprep.subr.bf16.mxu1 %v1170_v32 }
  0x8e   :  { %1007 = vmatpush3.bf16.msra.mxu0 %v1171_v33 }
  0x8f   :  { %1063 = vmatprep.subr.bf16.mxu0 %v1378_v39 }
  0x90   :  { %1025 = vmatpush3.bf16.msra.mxu1 %v1172_v34 }
  0x91   :  { %1026 = vmatprep.subr.bf16.mxu1 %v1173_v35 }
  0x94   :  { %1027 = vmatpush3.bf16.msra.mxu1 %v1174_v36 }
  0x95   :  { %1028 = vmatprep.subr.bf16.mxu1 %v1175_v37 }
  0x98   :  { %1029 = vmatpush3.bf16.msra.mxu1 %v1176_v38 }
  0x99   :  { %1083 = vmatprep.subr.bf16.mxu1 %v1378_v39 }
 0x146   :  { %v193_v47 = vpop.f32.mrb[0].mxu1 }
 0x147   :  { %v194_v48 = vadd.f32 %v193_v47, %v118_v45  ;;  %v195_v49 = vpop.f32.mrb[1].mxu1  ;;  %v1194_v45 = vld [vmem:[#allocation10 + $0x8] sm:$0xff]   ;;  %v1196_v47 = vld [vmem:[#allocation10 + $0x18] sm:$0xff]  }
 0x148   :  { %v196_v51 = vadd.f32 %v195_v49, %v122_v46  ;;  %v197_v52 = vpop.f32.mrb[2].mxu1  ;;  %v1195_v46 = vld [vmem:[#allocation10 + $0x10] sm:$0xff]   ;;  %v1198_v49 = vld [vmem:[#allocation10 + $0x28] sm:$0xff]  }
 0x149   :  { %v241_v54 = vmul.f32 0.2, %v194_v48  ;;  %v198_v55 = vpop.f32.mrb[3].mxu1 }
 0x14a   :  { %v242_v56 = vmul.f32 0.2, %v196_v51 }
 0x14b   :  { %v245_v57 = vmax.f32 %v194_v48, %v241_v54  ;;  %v1197_v48 = vld [vmem:[#allocation10 + $0x20] sm:$0xff]  }
 0x14c   :  { %v246_v60 = vmax.f32 %v196_v51, %v242_v56 }
 0x14d   :  { %v249_v0 = vpack.c.bf16 %v245_v57, %v245_v57 }
 0x14e   :  { %v234_v61 = vpop.f32.mrb[4].mxu1  ;;  %v250_v62 = vpack.c.bf16 %v246_v60, %v246_v60  ;;  %v1200_v60 = vld [vmem:[#allocation10 + $0x38] sm:$0xff]  }
 0x14f   :  { %v235_v1 = vadd.f32 %v234_v61, %v126_v58  ;;  %v236_v2 = vpop.f32.mrb[5].mxu1  ;;  %v106_v61 = vld [vmem:[#allocation11 + $0x3] ss:$0 sm:$0xff] }
 0x150   :  { %v237_v3 = vadd.f32 %v236_v2, %v130_v59  ;;  %v238_v4 = vpop.f32.mrb[6].mxu1  ;;  %541 = vmatprep.mubr.bf16.mxu0 %v250_v62  ;;  %v1199_v59 = vld [vmem:[#allocation10 + $0x30] sm:$0xff]  }
 0x151   :  { %v243_v5 = vmul.f32 0.2, %v235_v1  ;;  %v239_v6 = vpop.f32.mrb[7].mxu1  ;;  %542 = vmatmul.mubr.bf16.vlgmr.msra.gmra.mrb[0].mxu0 %v249_v0 }
 0x152   :  { %v244_v7 = vmul.f32 0.2, %v237_v3  ;;  %1064 = vmatpush3.bf16.msra.mxu0 %v1177_v63  ;;  %1079 = vmatprep.mubr.msk.bf16.mxu0 %vm1379_vm1, %v1378_v39  ;;  %v107_v6 = vld [vmem:[#allocation11 + $0x4] ss:$0 sm:$0xff] }
 0x153   :  { %v247_v9 = vmax.f32 %v235_v1, %v243_v5  ;;  %1065 = vmatprep.subr.bf16.mxu0 %v1378_v39 }
 0x154   :  { %v248_v10 = vmax.f32 %v237_v3, %v244_v7 }
 0x155   :  { %v251_v13 = vpack.c.bf16 %v247_v9, %v247_v9 }
 0x156   :  { %v252_v11 = vpack.c.bf16 %v248_v10, %v248_v10  ;;  %1066 = vmatpush3.bf16.msra.mxu0 %v1178_v8 }
 0x157   :  { %1067 = vmatprep.subr.bf16.mxu0 %v1378_v39 }
 0x158   :  { %581 = vmatprep.mubr.bf16.mxu1 %v252_v11 }
 0x159   :  { %582 = vmatmul.mubr.bf16.vlgmr.msra.gmra.mrb[8].mxu1 %v251_v13 }
 0x15a   :  { %1068 = vmatpush3.bf16.msra.mxu0 %v1179_v12  ;;  %1099 = vmatprep.mubr.msk.bf16.mxu1 %vm1379_vm1, %v1378_v39 }
 0x15b   :  { %1069 = vmatprep.subr.bf16.mxu0 %v1378_v39  ;;  %1084 = vmatpush3.bf16.msra.mxu1 %v1185_v19 }
 0x15c   :  { %1085 = vmatprep.subr.bf16.mxu1 %v1378_v39 }
 0x15e   :  { %1070 = vmatpush3.bf16.msra.mxu0 %v1180_v14 }
 0x15f   :  { %1071 = vmatprep.subr.bf16.mxu0 %v1378_v39  ;;  %1086 = vmatpush3.bf16.msra.mxu1 %v1186_v20 }
 0x160   :  { %1087 = vmatprep.subr.bf16.mxu1 %v1378_v39 }
 0x162   :  { %1072 = vmatpush3.bf16.msra.mxu0 %v1181_v15 }
 0x163   :  { %1073 = vmatprep.subr.bf16.mxu0 %v1378_v39  ;;  %1088 = vmatpush3.bf16.msra.mxu1 %v1187_v21 }
 0x164   :  { %1089 = vmatprep.subr.bf16.mxu1 %v1378_v39 }
 0x166   :  { %1074 = vmatpush3.bf16.msra.mxu0 %v1182_v16 }
 0x167   :  { %1075 = vmatprep.subr.bf16.mxu0 %v1378_v39  ;;  %1090 = vmatpush3.bf16.msra.mxu1 %v1188_v22 }
 0x168   :  { %1091 = vmatprep.subr.bf16.mxu1 %v1378_v39 }
 0x16a   :  { %1076 = vmatpush3.bf16.msra.mxu0 %v1183_v17 }
 0x16b   :  { %1077 = vmatprep.subr.bf16.mxu0 %v1378_v39  ;;  %1092 = vmatpush3.bf16.msra.mxu1 %v1189_v23 }
 0x16c   :  { %1093 = vmatprep.subr.bf16.mxu1 %v1378_v39 }
 0x16e   :  { %1078 = vmatpush3.bf16.msra.mxu0 %v1184_v18 }
 0x16f   :  { %1103 = vmatprep.subr.bf16.mxu0 %v1378_v39  ;;  %1094 = vmatpush3.bf16.msra.mxu1 %v1190_v24 }
 0x170   :  { %1095 = vmatprep.subr.bf16.mxu1 %v1378_v39 }
 0x173   :  { %1096 = vmatpush3.bf16.msra.mxu1 %v1191_v42 }
 0x174   :  { %1097 = vmatprep.subr.bf16.mxu1 %v1378_v39 }
 0x177   :  { %1098 = vmatpush3.bf16.msra.mxu1 %v1192_v43 }
 0x224   :  { %v1008_v25 = vpop.f32.mrb[0].mxu0 }
 0x225   :  { %v1009_v26 = vpop.f32.mrb[1].mxu0 }
 0x226   :  { %v1010_v27 = vadd.f32 %v1009_v26, %v1008_v25  ;;  %v1011_v28 = vpop.f32.mrb[2].mxu0 }
 0x227   :  { %v1012_v29 = vpop.f32.mrb[3].mxu0 }
 0x228   :  { %v544_v33 = vadd.f32 %v1010_v27, %v104_v30 }
 0x22c   :  { %v1030_v31 = vpop.f32.mrb[8].mxu1 }
 0x22d   :  { %v1031_v32 = vpop.f32.mrb[9].mxu1 }
 0x22e   :  { %v1032_v34 = vadd.f32 %v1031_v32, %v1030_v31  ;;  %v1033_v35 = vpop.f32.mrb[10].mxu1 }
 0x22f   :  { %v1034_v36 = vpop.f32.mrb[11].mxu1 }
 0x230   :  { %v584_v37 = vadd.f32 %v1032_v34, %v544_v33 }
 0x232   :  { %v589_v38 = vmul.f32 0.2, %v584_v37 }
 0x234   :  { %v590_v40 = vmax.f32 %v584_v37, %v589_v38 }
 0x236   :  { %v591_v41 = vpack.c.bf16 %v590_v40, %v590_v40 }
 0x238   :  { %1080 = vmatmul.mubr.bf16.vlgmr.msra.gmra.mrb[4].mxu0 %v591_v41 }
 0x239   :  { %1119 = vmatprep.mubr.msk.bf16.mxu0 %vm1379_vm1, %v1378_v39  ;;  %1104 = vmatpush3.bf16.msra.mxu0 %v1193_v44 }
 0x23a   :  { %1105 = vmatprep.subr.bf16.mxu0 %v1378_v39 }
 0x23d   :  { %1106 = vmatpush3.bf16.msra.mxu0 %v1194_v45 }
 0x23e   :  { %1107 = vmatprep.subr.bf16.mxu0 %v1378_v39 }
 0x241   :  { %1108 = vmatpush3.bf16.msra.mxu0 %v1195_v46 }
 0x242   :  { %1109 = vmatprep.subr.bf16.mxu0 %v1378_v39 }
 0x245   :  { %1110 = vmatpush3.bf16.msra.mxu0 %v1196_v47 }
 0x246   :  { %1111 = vmatprep.subr.bf16.mxu0 %v1378_v39 }
 0x249   :  { %1112 = vmatpush3.bf16.msra.mxu0 %v1197_v48 }
 0x24a   :  { %1113 = vmatprep.subr.bf16.mxu0 %v1378_v39 }
 0x24d   :  { %1114 = vmatpush3.bf16.msra.mxu0 %v1198_v49 }
 0x24e   :  { %1115 = vmatprep.subr.bf16.mxu0 %v1378_v39 }
 0x251   :  { %1116 = vmatpush3.bf16.msra.mxu0 %v1199_v59 }
 0x252   :  { %1117 = vmatprep.subr.bf16.mxu0 %v1378_v39 }
 0x255   :  { %1118 = vmatpush3.bf16.msra.mxu0 %v1200_v60 }
 0x30b   :  { %v690_v51 = vpop.f32.mrb[4].mxu0 }
 0x30c   :  { %v691_v52 = vadd.f32 %v690_v51, %v105_v50  ;;  %v1081_v53 = vpop.f32.mrb[5].mxu0 }
 0x30d   :  { %v693_v54 = vpop.f32.mrb[6].mxu0 }
 0x30e   :  { %v696_v55 = vmul.f32 0.2, %v691_v52  ;;  %v1082_v56 = vpop.f32.mrb[7].mxu0 }
 0x310   :  { %v697_v57 = vmax.f32 %v691_v52, %v696_v55 }
 0x312   :  { %v698_v58 = vpack.c.bf16 %v697_v57, %v697_v57 }
 0x314   :  { %1100 = vmatmul.mubr.bf16.vlgmr.msra.gmra.mrb[12].mxu1 %v698_v58 }
 0x3e7   :  { %v797_v62 = vpop.f32.mrb[12].mxu1 }
 0x3e8   :  { %v798_v63 = vadd.f32 %v797_v62, %v106_v61  ;;  %v1101_v0 = vpop.f32.mrb[13].mxu1 }
 0x3e9   :  { %v800_v1 = vpop.f32.mrb[14].mxu1 }
 0x3ea   :  { %v803_v2 = vmul.f32 0.2, %v798_v63  ;;  %v1102_v3 = vpop.f32.mrb[15].mxu1 }
 0x3ec   :  { %v804_v4 = vmax.f32 %v798_v63, %v803_v2 }
 0x3ee   :  { %v805_v5 = vpack.c.bf16 %v804_v4, %v804_v4 }
 0x3f0   :  { %1120 = vmatmul.mubr.bf16.vlgmr.msra.gmra.mrb[8].mxu0 %v805_v5 }
 0x4c3   :  { %v904_v7 = vpop.f32.mrb[8].mxu0 }
 0x4c4   :  { %v905_v8 = vadd.f32 %v904_v7, %v107_v6  ;;  %v1121_v9 = vpop.f32.mrb[9].mxu0 }
 0x4c5   :  { %v907_v10 = vpop.f32.mrb[10].mxu0 }
 0x4c6   :  { %v910_v39 = vpack.c.bf16 %v905_v8, %v905_v8  ;;  %v1122_v11 = vpop.f32.mrb[11].mxu0 }
 0x4c8   :  { %911 = vst [vmem:[#allocation13] sm:$0xf] %v910_v39 }
 0x4c9   :  { %1344 = shalt.err (!%p1341_p10)
}
 0x4ca   :  { %s1345_s22 = scalar_lea.hbm %s1545_s6, 64 }
 0x4cb   :  { %p1346_p11 = scmp.ne.s32.totalorder %s1545_s6, %s1345_s22  ;;  %p1349_p12 = scmp.lt.u32.totalorder %s1345_s22, %s1545_s6 }
 0x4cd   :  { %p1351_p13 = pnand %p1349_p12, %p1346_p11 }
 0x4cf   :  { %1354 = shalt.err (!%p1351_p13)
}
 0x4d0   :  { %921 = dma.vmem_to_hbm [thread:$0]  %s919_s20, 64, %s1545_s6, [#allocation4]  }
 0x4d1   :  { %1363 = dma.done.wait [#allocation4], 64  }
 0x4d2   :  { %1364 = vsyncadd [#allocation4], 4294967232 }
 0x4d3   :  { %925 = vsyncpa [#allocation3], 1 }
 0x4d4   :  { %926 = vsyncpa [#allocation6], 1 }
 0x4d5   :  { %927 = vsyncpa [#allocation9], 1 }
 0x4d6   :  { %928 = vsyncpa [#allocation12], 1 }
 0x4d7   :  { %929 = vsyncpa [#allocation4], 1 }

</bundles_post_ra>
